<compile_context>
chip_gen: v6e
topology: v6e:2x2x1
jax: 0.10.0
libtpu: 0.0.40
codegen_flags: <defaults>
</compile_context>

<pallas_src>
import functools

import jax
import jax.numpy as jnp
from jax.experimental import pallas as pl
from jax.experimental.pallas import tpu as pltpu


# ----------------------------------------------------------------------------
# Kernel body
# ----------------------------------------------------------------------------
def _sdpa_kernel(*refs, inv_temperature, has_mask, flatten_o, flatten_a):
    if has_mask:
        q_ref, k_ref, v_ref, mask_ref, out_ref, attn_ref = refs
    else:
        q_ref, k_ref, v_ref, out_ref, attn_ref = refs
        mask_ref = None

    q = q_ref[...]                                  # (bb, tq, D)  native dtype
    k = k_ref[...]                                  # (bb, Lk, D)
    v = v_ref[...]                                  # (bb, Lk, Dv)

    # Fold 1/temperature into q: O(tq*D) multiplies instead of scaling the
    # O(tq*Lk) score matrix; hidden under the MXU push.
    qs = q * jnp.asarray(inv_temperature, dtype=q.dtype)

    # scores = (q @ k^T) / temperature -- contract last axes (no explicit
    # transpose of k), f32 accumulation on the MXU.
    scores = jnp.einsum("bqd,bkd->bqk", qs, k,
                        preferred_element_type=jnp.float32)   # (bb, tq, Lk) f32

    if has_mask:
        # masked_fill_(mask, -inf); mask is int8, nonzero == masked.
        scores = jnp.where(mask_ref[...] != 0, -jnp.inf, scores)

    # Numerically stable softmax over the key axis (dim=2).  Fully masked
    # rows produce NaN, matching PyTorch masked_fill(-inf) + softmax.
    m = jnp.max(scores, axis=-1, keepdims=True)
    e = jnp.exp(scores - m)
    s = jnp.sum(e, axis=-1, keepdims=True)
    r = pl.reciprocal(s, approx=True)          # EUP vrcp (otherwise-idle slot)
    r = r * (2.0 - s * r)                      # one Newton step -> ~f32 accuracy
    attn = e * r                               # (bb, tq, Lk) f32

    # dropout(eval mode) = identity.

    # output = attn @ v -- probabilities cast to v.dtype so the MXU runs at
    # native (e.g. bf16) rate, accumulate in f32.
    out = jnp.einsum("bqk,bkd->bqd", attn.astype(v.dtype), v,
                     preferred_element_type=jnp.float32)      # (bb, tq, Dv)

    bb = out.shape[0]
    if flatten_o:
        # Lane-dense store: collapse minor dims so the stored slab's last dim
        # is tq*Dv (wide, unmasked vst) instead of a <128-lane masked store.
        out_ref[...] = out.reshape(bb, -1).astype(out_ref.dtype)
    else:
        out_ref[...] = out.astype(out_ref.dtype)
    if flatten_a:
        attn_ref[...] = attn.reshape(bb, -1).astype(attn_ref.dtype)
    else:
        attn_ref[...] = attn.astype(attn_ref.dtype)


# ----------------------------------------------------------------------------
# Hardware queries (defensive: fall back to conservative defaults)
# ----------------------------------------------------------------------------
def _vmem_capacity_bytes():
    try:
        cap = int(pltpu.get_tpu_info().vmem_capacity_bytes)
        if cap > 0:
            return cap
    except Exception:
        pass
    return 64 * 1024 * 1024  # conservative (v7x per-TensorCore)


def _num_tensorcores():
    n = 1
    try:
        info = pltpu.get_tpu_info()
        for name in ("num_cores", "num_tensorcores", "tensorcore_count", "core_count"):
            val = getattr(info, name, None)
            try:
                if val is not None and int(val) > 0:
                    n = max(n, int(val))
            except (TypeError, ValueError):
                pass
    except Exception:
        pass
    try:
        dev = jax.devices()[0]
        for name in ("num_cores", "core_count"):
            val = getattr(dev, name, None)
            if isinstance(val, int) and val > 0:
                n = max(n, val)
    except Exception:
        pass
    return n


# ----------------------------------------------------------------------------
# Tiling selection
# ----------------------------------------------------------------------------
def _divisors_desc(n):
    return [d for d in range(n, 0, -1) if n % d == 0]


def _step_vmem_bytes(bb, tq, *, Lk, D, Dv, q_isz, k_isz, v_isz, o_isz, a_isz,
                     has_mask):
    # Pipelined in/out blocks are double-buffered by Pallas (x2); the f32
    # temporaries (scores / exp / attn / f32 out / scaled q) are counted once.
    blocks = bb * (
        tq * D * q_isz                      # q block
        + Lk * D * k_isz                    # k block (resident across q-tiles)
        + Lk * Dv * v_isz                   # v block
        + (tq * Lk if has_mask else 0)      # int8 mask block
        + tq * Dv * o_isz                   # out block
        + tq * Lk * a_isz                   # attn block
    )
    temps = bb * (tq * D * q_isz + 3 * tq * Lk * 4 + tq * Dv * 4)
    return 2 * blocks + temps


def _select_tiles(B, Lq, Lk, D, Dv, *, q_isz, k_isz, v_isz, o_isz, a_isz,
                  has_mask, budget_bytes, num_cores):
    # q-tile candidates: full Lq, or divisors of Lq that are multiples of 8
    # ((8,128) second-to-last-dim rule).  Prefer >=256-wide M for the MXU.
    tq_cands = [d for d in _divisors_desc(Lq) if d == Lq or d % 8 == 0]
    if not tq_cands:
        tq_cands = [Lq]
    bb_cands = _divisors_desc(B)

    def fits(bb, tq):
        return _step_vmem_bytes(bb, tq, Lk=Lk, D=D, Dv=Dv, q_isz=q_isz,
                                k_isz=k_isz, v_isz=v_isz, o_isz=o_isz,
                                a_isz=a_isz, has_mask=has_mask) <= budget_bytes

    feasible = []
    for tq in tq_cands:
        for bb in bb_cands:
            if fits(bb, tq):
                g = (B // bb) * (Lq // tq)
                mxu_rank = 0 if (tq % 256 == 0 or tq == Lq) else (
                    1 if tq % 128 == 0 else 2)
                # Prefer: grid >= num_cores (megacore on v7x), then fewest
                # grid steps (per-step overhead), then MXU-friendly / big tq,
                # then big bb.
                feasible.append((g < num_cores, g, mxu_rank, -tq, -bb, bb, tq))
    if feasible:
        feasible.sort()
        _, _, _, _, _, bb, tq = feasible[0]
        return bb, tq
    # Nothing fits the budget: take the smallest blocks and let the compiler
    # try (vmem_limit is raised accordingly below).
    return 1, min(tq_cands)


# ----------------------------------------------------------------------------
# Cached pallas_call builder (static, shape-based decisions; jit-safe)
# ----------------------------------------------------------------------------
@functools.lru_cache(maxsize=None)
def _build_sdpa_call(B, Lq, Lk, D, Dv, q_dtype, k_dtype, v_dtype, has_mask,
                     inv_temperature):
    q_dt, k_dt, v_dt = jnp.dtype(q_dtype), jnp.dtype(k_dtype), jnp.dtype(v_dtype)
    out_dt = q_dt
    attn_dt = q_dt     # match the module: attn returned in q's dtype
    q_isz, k_isz, v_isz = q_dt.itemsize, k_dt.itemsize, v_dt.itemsize
    o_isz, a_isz = out_dt.itemsize, attn_dt.itemsize

    vmem_cap = _vmem_capacity_bytes()
    num_cores = _num_tensorcores()
    # Scoped limit: ~5/8 of physical (v7x 64 MiB -> 40 MiB; v5e/v6e 128 -> 80),
    # capped at 100 MiB; tile-selection budget = half of that (headroom for
    # Mosaic internal scratch / semaphores on top of our explicit 2x blocks).
    vmem_limit = min((vmem_cap * 5) // 8, 100 * 1024 * 1024)
    budget = vmem_limit // 2

    bb, tq = _select_tiles(B, Lq, Lk, D, Dv, q_isz=q_isz, k_isz=k_isz,
                           v_isz=v_isz, o_isz=o_isz, a_isz=a_isz,
                           has_mask=has_mask, budget_bytes=budget,
                           num_cores=num_cores)
    needed = _step_vmem_bytes(bb, tq, Lk=Lk, D=D, Dv=Dv, q_isz=q_isz,
                              k_isz=k_isz, v_isz=v_isz, o_isz=o_isz,
                              a_isz=a_isz, has_mask=has_mask)
    vmem_limit = max(vmem_limit, min(int(vmem_cap * 0.9), needed + (4 << 20)))
    grid = (B // bb, Lq // tq)

    # Static lane-dense flatten decision, per output: only flatten when the
    # minor dim is NOT already a 128-multiple (otherwise stores are unmasked
    # and the in-kernel relayout would be pure overhead), and only when the
    # flattened 2-D block satisfies the (8,128) rule.
    def _flatten_ok(minor):
        if minor % 128 == 0:
            return False
        if not (bb % 8 == 0 or bb == B):
            return False
        return (tq == Lq) or ((tq * minor) % 128 == 0)

    flatten_o = _flatten_ok(Dv)
    flatten_a = _flatten_ok(Lk)

    kernel = functools.partial(
        _sdpa_kernel,
        inv_temperature=float(inv_temperature),
        has_mask=has_mask,
        flatten_o=flatten_o,
        flatten_a=flatten_a,
    )

    in_specs = [
        pl.BlockSpec((bb, tq, D), lambda b, qi: (b, qi, 0)),
        pl.BlockSpec((bb, Lk, D), lambda b, qi: (b, 0, 0)),   # resident in qi
        pl.BlockSpec((bb, Lk, Dv), lambda b, qi: (b, 0, 0)),  # resident in qi
    ]
    if has_mask:
        in_specs.append(pl.BlockSpec((bb, tq, Lk), lambda b, qi: (b, qi, 0)))

    out_shape, out_specs = [], []
    if flatten_o:
        out_shape.append(jax.ShapeDtypeStruct((B, Lq * Dv), out_dt))
        out_specs.append(pl.BlockSpec((bb, tq * Dv), lambda b, qi: (b, qi)))
    else:
        out_shape.append(jax.ShapeDtypeStruct((B, Lq, Dv), out_dt))
        out_specs.append(pl.BlockSpec((bb, tq, Dv), lambda b, qi: (b, qi, 0)))
    if flatten_a:
        out_shape.append(jax.ShapeDtypeStruct((B, Lq * Lk), attn_dt))
        out_specs.append(pl.BlockSpec((bb, tq * Lk), lambda b, qi: (b, qi)))
    else:
        out_shape.append(jax.ShapeDtypeStruct((B, Lq, Lk), attn_dt))
        out_specs.append(pl.BlockSpec((bb, tq, Lk), lambda b, qi: (b, qi, 0)))

    bytes_accessed = (
        B * Lq * D * q_isz + B * Lk * D * k_isz + B * Lk * Dv * v_isz
        + (B * Lq * Lk if has_mask else 0)
        + B * Lq * Dv * o_isz + B * Lq * Lk * a_isz
    )
    cost = pl.CostEstimate(
        flops=2 * B * Lq * Lk * (D + Dv),
        transcendentals=B * Lq * Lk,
        bytes_accessed=bytes_accessed,
    )

    call = pl.pallas_call(
        kernel,
        out_shape=tuple(out_shape),
        grid_spec=pltpu.PrefetchScalarGridSpec(
            num_scalar_prefetch=0,
            grid=grid,
            in_specs=in_specs,
            out_specs=out_specs,
        ),
        compiler_params=pltpu.CompilerParams(
            dimension_semantics=("parallel", "parallel"),
            vmem_limit_bytes=int(vmem_limit),
        ),
        cost_estimate=cost,
    )
    return call, flatten_o, flatten_a


# ----------------------------------------------------------------------------
# Public wrapper
# ----------------------------------------------------------------------------
def scaled_dot_product_attention(q, k, v, mask=None, *, temperature):
    """Returns (output, attn) exactly like the PyTorch module's forward (eval)."""
    B, Lq, D = q.shape
    _, Lk, Dk = k.shape
    _, _, Dv = v.shape
    assert D == Dk and k.shape[0] == B and v.shape[0] == B and v.shape[1] == Lk

    has_mask = mask is not None
    # int8 mask: 4x less HBM/DMA traffic than int32/bool-as-i32.
    mask_i8 = mask.astype(jnp.int8) if has_mask else None

    call, flatten_o, flatten_a = _build_sdpa_call(
        B, Lq, Lk, D, Dv,
        jnp.dtype(q.dtype).name, jnp.dtype(k.dtype).name, jnp.dtype(v.dtype).name,
        has_mask, 1.0 / float(temperature),
    )

    args = (q, k, v, mask_i8) if has_mask else (q, k, v)
    out, attn = call(*args)
    if flatten_o:
        out = out.reshape(B, Lq, Dv)
    if flatten_a:
        attn = attn.reshape(B, Lq, Lk)
    return out, attn


# ----------------------------------------------------------------------------
# Reference + self-test
# ----------------------------------------------------------------------------
def _reference(q, k, v, mask, temperature):
    attn = jnp.einsum("bqd,bkd->bqk", q, k) / temperature
    if mask is not None:
        attn = jnp.where(mask, -jnp.inf, attn)
    attn = jax.nn.softmax(attn, axis=2)
    out = jnp.einsum("bqk,bkd->bqd", attn, v)
    return out, attn


if __name__ == "__main__":
    key = jax.random.PRNGKey(0)
    kq, kk, kv, km = jax.random.split(key, 4)

    B, Lq, Lk, D, Dv = 2, 8, 8, 32, 32
    temperature = float(D) ** 0.5  # typical FastSpeech setting: sqrt(d_k)

    q = jax.random.normal(kq, (B, Lq, D), dtype=jnp.float32)
    k = jax.random.normal(kk, (B, Lk, D), dtype=jnp.float32)
    v = jax.random.normal(kv, (B, Lk, Dv), dtype=jnp.float32)
    # Random boolean mask (True = masked out); keep at least one unmasked key
    # per query row to avoid all -inf rows (NaN, same as PyTorch).
    mask = jax.random.bernoulli(km, p=0.2, shape=(B, Lq, Lk))
    mask = mask.at[:, :, 0].set(False)

    # Masked path.
    out, attn = scaled_dot_product_attention(q, k, v, mask, temperature=temperature)
    out = jax.block_until_ready(out)
    attn = jax.block_until_ready(attn)
    ref_out, ref_attn = _reference(q, k, v, mask, temperature)
    assert jnp.allclose(out, ref_out, atol=5e-4, rtol=5e-4)
    assert jnp.allclose(attn, ref_attn, atol=5e-4, rtol=5e-4)

    # No-mask fast path (no zero-mask DMA).
    out2, attn2 = scaled_dot_product_attention(q, k, v, None, temperature=temperature)
    out2 = jax.block_until_ready(out2)
    attn2 = jax.block_until_ready(attn2)
    ref_out2, ref_attn2 = _reference(q, k, v, None, temperature)
    assert jnp.allclose(out2, ref_out2, atol=5e-4, rtol=5e-4)
    assert jnp.allclose(attn2, ref_attn2, atol=5e-4, rtol=5e-4)

    print("KERNEL_OK")
</pallas_src>

<mosaic_0001>
module attributes {stable_mosaic.version = 11 : i64} {
  func.func @_sdpa_kernel(%arg0: i32, %arg1: i32, %arg2: memref<2x8x32xf32, #tpu.memory_space<vmem>>, %arg3: memref<2x8x32xf32, #tpu.memory_space<vmem>>, %arg4: memref<2x8x32xf32, #tpu.memory_space<vmem>>, %arg5: memref<2x8x8xi8, #tpu.memory_space<vmem>>, %arg6: memref<2x256xf32, #tpu.memory_space<vmem>>, %arg7: memref<2x64xf32, #tpu.memory_space<vmem>>) attributes {dimension_semantics = [#tpu.dimension_semantics<parallel>, #tpu.dimension_semantics<parallel>], iteration_bounds = array<i64: 1, 1>, scalar_prefetch = 0 : i64, scratch_operands = 0 : i64, tpu.core_type = #tpu.core_type<tc>, window_params = [{transform_indices = @transform_0, window_bounds = array<i64: 2, 8, 32>}, {transform_indices = @transform_1, window_bounds = array<i64: 2, 8, 32>}, {transform_indices = @transform_2, window_bounds = array<i64: 2, 8, 32>}, {transform_indices = @transform_3, window_bounds = array<i64: 2, 8, 8>}, {transform_indices = @transform_4, window_bounds = array<i64: 2, 256>}, {transform_indices = @transform_5, window_bounds = array<i64: 2, 64>}]} {
    %c0 = arith.constant 0 : index
    %c0_0 = arith.constant 0 : index
    %c0_1 = arith.constant 0 : index
    %0 = vector.load %arg2[%c0, %c0_0, %c0_1] : memref<2x8x32xf32, #tpu.memory_space<vmem>>, vector<2x8x32xf32>
    %c0_2 = arith.constant 0 : index
    %c0_3 = arith.constant 0 : index
    %c0_4 = arith.constant 0 : index
    %1 = vector.load %arg3[%c0_2, %c0_3, %c0_4] : memref<2x8x32xf32, #tpu.memory_space<vmem>>, vector<2x8x32xf32>
    %c0_5 = arith.constant 0 : index
    %c0_6 = arith.constant 0 : index
    %c0_7 = arith.constant 0 : index
    %2 = vector.load %arg4[%c0_5, %c0_6, %c0_7] : memref<2x8x32xf32, #tpu.memory_space<vmem>>, vector<2x8x32xf32>
    %cst = arith.constant 0.176776692 : f32
    %3 = vector.broadcast %cst : f32 to vector<2x8x32xf32>
    %4 = arith.mulf %0, %3 : vector<2x8x32xf32>
    "tpu.trace_start"() <{level = 10 : i32, message = "bqd,bkd->bqk"}> : () -> ()
    %cst_8 = arith.constant dense<0.000000e+00> : vector<2x8x8xf32>
    %5 = tpu.matmul %4, %1, %cst_8 {dimension_numbers = #tpu.dot_dimension_numbers<[2], [2], [1], [1], [0, 0, 0, 1, 1, 1], [0], [0]>} : vector<2x8x32xf32>, vector<2x8x32xf32>, vector<2x8x8xf32> -> vector<2x8x8xf32>
    "tpu.trace_stop"() : () -> ()
    %c0_9 = arith.constant 0 : index
    %c0_10 = arith.constant 0 : index
    %c0_11 = arith.constant 0 : index
    %6 = vector.load %arg5[%c0_9, %c0_10, %c0_11] : memref<2x8x8xi8, #tpu.memory_space<vmem>>, vector<2x8x8xi8>
    %c0_i8 = arith.constant 0 : i8
    %7 = vector.broadcast %c0_i8 : i8 to vector<2x8x8xi8>
    %8 = arith.cmpi ne, %6, %7 : vector<2x8x8xi8>
    %cst_12 = arith.constant 0xFF800000 : f32
    %9 = vector.broadcast %cst_12 : f32 to vector<2x8x8xf32>
    %10 = arith.select %8, %9, %5 : vector<2x8x8xi1>, vector<2x8x8xf32>
    %cst_13 = arith.constant dense<0xFF800000> : vector<2x8xf32>
    %11 = vector.multi_reduction <maximumf>, %10, %cst_13 [2] : vector<2x8x8xf32> to vector<2x8xf32>
    %12 = vector.shape_cast %11 : vector<2x8xf32> to vector<2x8x1xf32>
    %13 = vector.broadcast %12 : vector<2x8x1xf32> to vector<2x8x8xf32>
    %14 = arith.subf %10, %13 : vector<2x8x8xf32>
    %15 = math.exp %14 : vector<2x8x8xf32>
    %cst_14 = arith.constant dense<0.000000e+00> : vector<2x8xf32>
    %16 = vector.multi_reduction <add>, %15, %cst_14 [2] : vector<2x8x8xf32> to vector<2x8xf32>
    %17 = vector.shape_cast %16 : vector<2x8xf32> to vector<2x8x1xf32>
    %18 = tpu.reciprocal %17 {approx = true} : vector<2x8x1xf32> -> vector<2x8x1xf32>
    %19 = arith.mulf %17, %18 : vector<2x8x1xf32>
    %cst_15 = arith.constant 2.000000e+00 : f32
    %20 = vector.broadcast %cst_15 : f32 to vector<2x8x1xf32>
    %21 = arith.subf %20, %19 : vector<2x8x1xf32>
    %22 = arith.mulf %18, %21 : vector<2x8x1xf32>
    %23 = vector.broadcast %22 : vector<2x8x1xf32> to vector<2x8x8xf32>
    %24 = arith.mulf %15, %23 : vector<2x8x8xf32>
    "tpu.trace_start"() <{level = 10 : i32, message = "bqk,bkd->bqd"}> : () -> ()
    %cst_16 = arith.constant dense<0.000000e+00> : vector<2x8x32xf32>
    %25 = tpu.matmul %24, %2, %cst_16 {dimension_numbers = #tpu.dot_dimension_numbers<[2], [1], [1], [2], [0, 0, 0, 1, 1, 2], [0], [0]>} : vector<2x8x8xf32>, vector<2x8x32xf32>, vector<2x8x32xf32> -> vector<2x8x32xf32>
    "tpu.trace_stop"() : () -> ()
    %26 = vector.shape_cast %25 : vector<2x8x32xf32> to vector<2x256xf32>
    %c0_17 = arith.constant 0 : index
    %c0_18 = arith.constant 0 : index
    %27 = vector.load %arg6[%c0_17, %c0_18] : memref<2x256xf32, #tpu.memory_space<vmem>>, vector<2x256xf32>
    tpu.vector_store %arg6[%c0_17, %c0_18], %26 {strides = array<i32>} : memref<2x256xf32, #tpu.memory_space<vmem>>, vector<2x256xf32>,
    %28 = vector.shape_cast %24 : vector<2x8x8xf32> to vector<2x64xf32>
    %c0_19 = arith.constant 0 : index
    %c0_20 = arith.constant 0 : index
    %29 = vector.load %arg7[%c0_19, %c0_20] : memref<2x64xf32, #tpu.memory_space<vmem>>, vector<2x64xf32>
    tpu.vector_store %arg7[%c0_19, %c0_20], %28 {strides = array<i32>} : memref<2x64xf32, #tpu.memory_space<vmem>>, vector<2x64xf32>,
    return
  }
  func.func @transform_0(%arg0: i32, %arg1: i32) -> (i32, i32, i32) {
    %c0_i32 = arith.constant 0 : i32
    %c0_i32_0 = arith.constant 0 : i32
    return %arg0, %arg1, %c0_i32 : i32, i32, i32
  }
  func.func @transform_1(%arg0: i32, %arg1: i32) -> (i32, i32, i32) {
    %c0_i32 = arith.constant 0 : i32
    %c0_i32_0 = arith.constant 0 : i32
    %c0_i32_1 = arith.constant 0 : i32
    return %arg0, %c0_i32, %c0_i32_0 : i32, i32, i32
  }
  func.func @transform_2(%arg0: i32, %arg1: i32) -> (i32, i32, i32) {
    %c0_i32 = arith.constant 0 : i32
    %c0_i32_0 = arith.constant 0 : i32
    %c0_i32_1 = arith.constant 0 : i32
    return %arg0, %c0_i32, %c0_i32_0 : i32, i32, i32
  }
  func.func @transform_3(%arg0: i32, %arg1: i32) -> (i32, i32, i32) {
    %c0_i32 = arith.constant 0 : i32
    %c0_i32_0 = arith.constant 0 : i32
    return %arg0, %arg1, %c0_i32 : i32, i32, i32
  }
  func.func @transform_4(%arg0: i32, %arg1: i32) -> (i32, i32) {
    %c0_i32 = arith.constant 0 : i32
    return %arg0, %arg1 : i32, i32
  }
  func.func @transform_5(%arg0: i32, %arg1: i32) -> (i32, i32) {
    %c0_i32 = arith.constant 0 : i32
    return %arg0, %arg1 : i32, i32
  }
}

</mosaic_0001>

<bundles_post_ra>
// kernel: tpu_custom_call.1
= control target key start
LH: loop header
LB: loop body
LE: loop exit
PB: predicated region body
PF: predicated region fallthrough
CT: control target
= control target key end

     0   :  { %11 = vsyncpa [#allocation3], 0  ;;  %s952_s0 = inlined_call_operand.hbm [shape: f32[2,8,32], index: 0, kind: input, shape index: {}]   ;;  %s953_s1 = inlined_call_operand.hbm [shape: f32[2,8,32], index: 1, kind: input, shape index: {}]   ;;  %s954_s2 = inlined_call_operand.hbm [shape: f32[2,8,32], index: 2, kind: input, shape index: {}]   ;;  %s955_s3 = inlined_call_operand.vmem [shape: s8[2,8,8], index: 3, kind: input, shape index: {}]   ;;  %s956_s4 = inlined_call_operand.hbm [shape: f32[2,256], index: 4, kind: output, shape index: {0}]   ;;  %s957_s5 = inlined_call_operand.hbm [shape: f32[2,64], index: 5, kind: output, shape index: {1}]  }
   0x1   :  { %12 = vsyncpa [#allocation6], 0 }
   0x2   :  { %13 = vsyncpa [#allocation4], 0 }
   0x3   :  { %14 = vsyncpa [#allocation10], 0  ;;  %s831_s18 = smov [#allocation5]   ;;  %s832_s20 = smov [#allocation2]  }
   0x4   :  { %s32_s19 = sshll.u32 %s831_s18, 4  ;;  %s20_s21 = sshll.u32 %s832_s20, 4  ;;  %s33_s19 = int_to_ptr.vmem [resolvable:$true] %s32_s19  ;;  %s21_s21 = int_to_ptr.vmem [resolvable:$true] %s20_s21 }
   0x5   :  { %s731_s22 = scalar_lea.vmem %s33_s19, 256  ;;  %p736_p1 = scmp.lt.s32.totalorder %s33_s19, %s33_s19 }
   0x6   :  { %p732_p0 = scmp.ne.s32.totalorder %s33_s19, %s731_s22  ;;  %p737_p2 = scmp.lt.s32.totalorder %s731_s22, %s731_s22 }
   0x8   :  { %p738_p3 = por %p737_p2, %p736_p1 }
   0xa   :  { %p739_p4 = pnand %p738_p3, %p732_p0 }
   0xc   :  { %742 = shalt.err (!%p739_p4)
}
   0xd   :  { %s833_s23 = smov 128   ;;  %s834_s24 = smov 8  }
   0xe   :  { %38 = dma.hbm_to_vmem [thread:$0]  %s953_s1, 256, %s33_s19, [#allocation6], %s833_s23, %s833_s23, %s834_s24  }
   0xf   :  { %s751_s27 = scalar_lea.vmem %s21_s21, 256  ;;  %p756_p6 = scmp.lt.s32.totalorder %s21_s21, %s21_s21 }
  0x10   :  { %p752_p5 = scmp.ne.s32.totalorder %s21_s21, %s751_s27  ;;  %p757_p7 = scmp.lt.s32.totalorder %s751_s27, %s751_s27 }
  0x12   :  { %p758_p8 = por %p757_p7, %p756_p6 }
  0x14   :  { %p759_p9 = pnand %p758_p8, %p752_p5 }
  0x16   :  { %762 = shalt.err (!%p759_p9)
}
  0x17   :  { %26 = dma.hbm_to_vmem [thread:$0]  %s952_s0, 256, %s21_s21, [#allocation3], %s833_s23, %s833_s23, %s834_s24  }
  0x18   :  { %s835_s30 = smov [#allocation7]  }
  0x19   :  { %s44_s6 = sshll.u32 %s835_s30, 4  ;;  %s45_s6 = int_to_ptr.vmem [resolvable:$true] %s44_s6 }
  0x1a   :  { %s771_s7 = scalar_lea.vmem %s45_s6, 256  ;;  %p776_p11 = scmp.lt.s32.totalorder %s45_s6, %s45_s6 }
  0x1b   :  { %p772_p10 = scmp.ne.s32.totalorder %s45_s6, %s771_s7  ;;  %p777_p12 = scmp.lt.s32.totalorder %s771_s7, %s771_s7 }
  0x1d   :  { %p778_p13 = por %p777_p12, %p776_p11 }
  0x1f   :  { %p779_p0 = pnand %p778_p13, %p772_p10 }
  0x21   :  { %782 = shalt.err (!%p779_p0)
}
  0x22   :  { %50 = dma.hbm_to_vmem [thread:$0]  %s954_s2, 256, %s45_s6, [#allocation6], %s833_s23, %s833_s23, %s834_s24  }
  0x23   :  { %823 = dma.done.wait [#allocation3], 256  }
  0x24   :  { %824 = vsyncadd [#allocation3], 4294967040 }
  0x25   :  { %825 = dma.done.wait [#allocation6], 512  }
  0x26   :  { %826 = vsyncadd [#allocation6], 4294966784  ;;  %v836_v0 = vmov 0.0   ;;  %vm837_vm0 = vmmov 0   ;;  %vm72_vm1 = vcmask 261120   ;;  %v66_v1 = vld [vmem:[#allocation5] sm:$0xff]  ;;  %v416_v40 = vlaneseq }
  0x27   :  { %675 = vmatprep.subr.mxu0 %v836_v0  ;;  %680 = vmatprep.subr.mxu1 %v836_v0  ;;  %v67_v2 = vld [vmem:[#allocation5 + $0x8] sm:$0xff]  ;;  %v64_v3 = vld [vmem:[#allocation2] sm:$0xff]  ;;  %v65_v5 = vld [vmem:[#allocation2 + $0x8] sm:$0xff]  ;;  %v838_v9 = vmov 0   ;;  %vm237_vm6 = vcmask 64512   ;;  %s842_s11 = smov 32  }
  0x28   :  { %677 = vmatprep.mubr.msk.f32.mxu0 %vm837_vm0, %v836_v0  ;;  %682 = vmatprep.mubr.msk.f32.mxu1 %vm837_vm0, %v836_v0  ;;  %v70_v4 = vmul.f32 0.17677669, %v64_v3  ;;  %v71_v6 = vmul.f32 0.17677669, %v65_v5  ;;  %v225_v7 = vld [vmem:[%s955_s3] sm:$0x3] }
  0x29   :  { %676 = vmatpush3.xpose.msk.msra.mxu0 %vm72_vm1, %v66_v1  ;;  %681 = vmatpush3.xpose.msk.msra.mxu1 %vm72_vm1, %v67_v2  ;;  %v226_v8 = vld [vmem:[%s955_s3 + $0x2] sm:$0x3]  ;;  %vm227_vm2 = vnez %v225_v7  ;;  %v69_v33 = vld [vmem:[#allocation7 + $0x8] sm:$0xff]  ;;  %v839_v37 = vmov 1983009808   ;;  %v417_v46 = vshrl.u32 %v416_v40, 7 }
  0x2a   :  { %685 = vmatprep.subr.mxu0 %v836_v0  ;;  %690 = vmatprep.subr.mxu1 %v836_v0  ;;  %vm228_vm3 = vnez %v226_v8  ;;  %v229_v10 = vsel %vm227_vm2, 16843009, %v838_v9  ;;  %v68_v32 = vld [vmem:[#allocation7] sm:$0xff]  ;;  %v414_v38 = vunpack.c.l.s4 %v839_v37  ;;  %v840_v47 = vmov 1934713408   ;;  %s841_s3 = smov 16  }
  0x2b   :  { %v230_v11 = vsel %vm228_vm3, 16843009, %v838_v9  ;;  %v231_v12 = vunpack.c.0.s8 %v229_v10  ;;  %v445_v48 = vunpack.c.l.s4 %v840_v47  ;;  %s843_s12 = smov 24   ;;  %s844_s13 = smov 40   ;;  %vm503_vm7 = vcmask 523264  }
  0x2c   :  { %678 = vmatmul.mubr.msk.f32.vlgmr.msra.gmra.mxu0 %vm72_vm1, %v70_v4  ;;  %683 = vmatmul.mubr.msk.f32.vlgmr.msra.gmra.mxu1 %vm72_vm1, %v71_v6  ;;  %v232_v13 = vunpack.c.0.s8 %v230_v11  ;;  %v415_v43 = vunpack.c.0.s8 %v414_v38  ;;  %s845_s14 = smov 64   ;;  %s846_s15 = smov 96   ;;  %vm617_vm8 = vcmask 130048   ;;  %vm619_vm9 = vcmask 195584  }
  0x2d   :  { %687 = vmatprep.mubr.msk.f32.mxu0 %vm837_vm0, %v836_v0  ;;  %692 = vmatprep.mubr.msk.f32.mxu1 %vm837_vm0, %v836_v0  ;;  %vm233_vm4 = vcmp.ne.s32.totalorder %v231_v12, 0  ;;  %v446_v53 = vunpack.c.0.s8 %v445_v48  ;;  %s847_s16 = smov 56   ;;  %s848_s17 = smov 48   ;;  %vm505_vm10 = vcmask 785408   ;;  %vm622_vm11 = vcmask 326656  }
  0x2e   :  { %vm234_vm5 = vcmp.ne.s32.totalorder %v232_v13, 0  ;;  %686 = vmatpush3.msra.mxu0 %v68_v32  ;;  %691 = vmatpush3.msra.mxu1 %v69_v33  ;;  %v418_v52 = vsub.s32 %v415_v43, %v417_v46  ;;  %s849_s18 = smov [#allocation8]   ;;  %s850_s20 = smov [#allocation9]   ;;  %vm624_vm12 = vcmask 392192   ;;  %vm626_vm13 = vcmask 457728  }
  0x2f   :  { %v449_v56 = vsub.s32 %v446_v53, %v417_v46  ;;  %s636_s19 = sshll.u32 %s849_s18, 4  ;;  %s646_s21 = sshll.u32 %s850_s20, 4  ;;  %vm628_vm14 = vcmask 517120   ;;  %s637_s19 = int_to_ptr.vmem [resolvable:$true] %s636_s19  ;;  %s647_s21 = int_to_ptr.vmem [resolvable:$true] %s646_s21 }
  0x30   :  { %s783_s22 = scalar_lea.vmem %s637_s19, 64  ;;  %p788_p2 = scmp.lt.s32.totalorder %s637_s19, %s637_s19 }
  0x31   :  { %p784_p1 = scmp.ne.s32.totalorder %s637_s19, %s783_s22  ;;  %p789_p3 = scmp.lt.s32.totalorder %s783_s22, %s783_s22 }
  0x33   :  { %p790_p4 = por %p789_p3, %p788_p2 }
  0x35   :  { %p791_p5 = pnand %p790_p4, %p784_p1 }
  0xec   :  { %v145_v14 = vpop.f32.mrf.mxu0  ;;  %v221_v15 = vpop.f32.mrf.mxu1 }
  0xed   :  { %v235_v16 = vsel %vm233_vm4, -inf, %v145_v14  ;;  %v236_v17 = vsel %vm234_vm5, -inf, %v221_v15 }
  0xee   :  { %v679_v18 = vpop.f32.mrf.mxu0  ;;  %v238_v19 = vsel %vm237_vm6, %v235_v16, -inf  ;;  %v684_v20 = vpop.f32.mrf.mxu1  ;;  %v241_v21 = vsel %vm237_vm6, %v236_v17, -inf }
  0xef   :  { %239 = vmax.xlane.f32.xlu0 %v238_v19 }
  0xf3   :  { %242 = vmax.xlane.f32.xlu0 %v241_v21 }
 0x178   :  { %v240_v22 = vpop.xlane.xlu0 %239 }
 0x179   :  { %v244_v23 = vsub.f32 %v235_v16, %v240_v22 }
 0x17b   :  { %v246_v24 = vmul.f32 1.442695, %v244_v23 }
 0x17c   :  { %v243_v25 = vpop.xlane.xlu0 %242 }
 0x17d   :  { %715 = vpow2.f32 %v246_v24  ;;  %v245_v26 = vsub.f32 %v236_v17, %v243_v25 }
 0x17f   :  { %v248_v27 = vmul.f32 1.442695, %v245_v26 }
 0x181   :  { %717 = vpow2.f32 %v248_v27 }
 0x18a   :  { %v716_v28 = vpop.eup %715 }
 0x18b   :  { %v250_v29 = vsel %vm237_vm6, %v716_v28, 0.0 }
 0x18c   :  { %251 = vadd.xlane.f32.xlu1 %v250_v29 }
 0x18e   :  { %v718_v30 = vpop.eup %717 }
 0x18f   :  { %v253_v31 = vsel %vm237_vm6, %v718_v30, 0.0 }
 0x190   :  { %254 = vadd.xlane.f32.xlu1 %v253_v31 }
 0x215   :  { %v252_v34 = vpop.xlane.xlu1 %251 }
 0x216   :  { %719 = vrcp.f32 %v252_v34 }
 0x219   :  { %v255_v35 = vpop.xlane.xlu1 %254 }
 0x21a   :  { %721 = vrcp.f32 %v255_v35 }
 0x223   :  { %v720_v36 = vpop.eup %719 }
 0x224   :  { %v258_v39 = vmul.f32 %v720_v36, %v252_v34 }
 0x226   :  { %v260_v41 = vsub.f32 2.0, %v258_v39 }
 0x227   :  { %v722_v42 = vpop.eup %721 }
 0x228   :  { %v262_v44 = vmul.f32 %v720_v36, %v260_v41  ;;  %v259_v45 = vmul.f32 %v722_v42, %v255_v35 }
 0x22a   :  { %v264_v49 = vmul.f32 %v716_v28, %v262_v44  ;;  %v261_v50 = vsub.f32 2.0, %v259_v45 }
 0x22c   :  { %v263_v51 = vmul.f32 %v722_v42, %v261_v50  ;;  %688 = vmatmul.mubr.msk.f32.vlgmr.msra.gmra.mxu0 %vm237_vm6, %v264_v49  ;;  %v522_v55 = vcombine.high %v264_v49, %v836_v0  ;;  %v529_v57 = vrot.slane %v264_v49, %v418_v52 }
 0x22e   :  { %v265_v54 = vmul.f32 %v718_v30, %v263_v51  ;;  %v536_v62 = vrot.slane %v522_v55, %v418_v52 }
 0x230   :  { %693 = vmatmul.mubr.msk.f32.vlgmr.msra.gmra.mxu1 %vm237_vm6, %v265_v54  ;;  %v544_v58 = vrot.slane %v265_v54, %v418_v52  ;;  %v537_v59 = vcombine.high %v265_v54, %v836_v0 }
 0x232   :  { %v553_v60 = vcombine.high %v529_v57, %v544_v58  ;;  %v552_v61 = vcombine.low %v529_v57, %v544_v58  ;;  %v551_v63 = vrot.slane %v537_v59, %v418_v52 }
 0x234   :  { %v567_v1 = vrot.slane %v553_v60, %v449_v56  ;;  %v923_v2 = vrot.slane %v552_v61, %v449_v56  ;;  %v568_v3 = vcombine.low %v536_v62, %v551_v63  ;;  %v569_v4 = vcombine.high %v536_v62, %v551_v63 }
 0x236   :  { %593 = vrot.lane.b32.xlu1 %v567_v1, %s841_s3  ;;  %v584_v5 = vcombine.high %v923_v2, %v836_v0  ;;  %v576_v6 = vrot.slane %v568_v3, %v449_v56  ;;  %v585_v7 = vcombine.high %v567_v1, %v836_v0  ;;  %v583_v29 = vrot.slane %v569_v4, %v449_v56 }
 0x238   :  { %589 = vrot.lane.b32.xlu0 %v584_v5, %s834_s24  ;;  %v586_v8 = vcombine.high %v576_v6, %v836_v0  ;;  %v587_v31 = vcombine.high %v583_v29, %v836_v0 }
 0x23a   :  { %601 = vrot.lane.b32.xlu1 %v576_v6, %s842_s11 }
 0x23c   :  { %597 = vrot.lane.b32.xlu0 %v585_v7, %s843_s12 }
 0x240   :  { %605 = vrot.lane.b32.xlu0 %v586_v8, %s844_s13 }
 0x2a8   :  { %v594_v34 = vpop.permute.xlu1 %593 }
 0x2aa   :  { %v590_v33 = vpop.permute.xlu0 %589 }
 0x2ab   :  { %v616_v42 = vsel %vm237_vm6, %v923_v2, %v590_v33 }
 0x2ac   :  { %v602_v36 = vpop.permute.xlu1 %601  ;;  %v618_v46 = vsel %vm617_vm8, %v616_v42, %v594_v34 }
 0x2ae   :  { %v598_v35 = vpop.permute.xlu0 %597 }
 0x2af   :  { %v620_v47 = vsel %vm619_vm9, %v618_v46, %v598_v35 }
 0x2b0   :  { %v621_v53 = vsel %vm72_vm1, %v620_v47, %v602_v36 }
 0x2b2   :  { %v606_v37 = vpop.permute.xlu0 %605 }
 0x2b3   :  { %v623_v54 = vsel %vm622_vm11, %v621_v53, %v606_v37 }
 0x2ec   :  { %v335_v9 = vpop.f32.mrf.mxu0 }
 0x2ed   :  { %v412_v11 = vcombine.high %v335_v9, %v836_v0  ;;  %v419_v13 = vrot.slane %v335_v9, %v418_v52 }
 0x2ee   :  { %v689_v10 = vpop.f32.mrf.mxu0 }
 0x2ef   :  { %v426_v17 = vrot.slane %v412_v11, %v418_v52 }
 0x2f0   :  { %v408_v12 = vpop.f32.mrf.mxu1 }
 0x2f1   :  { %v427_v14 = vcombine.high %v408_v12, %v836_v0  ;;  %v434_v15 = vrot.slane %v408_v12, %v418_v52 }
 0x2f2   :  { %v694_v16 = vpop.f32.mrf.mxu1 }
 0x2f3   :  { %v441_v18 = vrot.slane %v427_v14, %v418_v52  ;;  %v442_v19 = vcombine.low %v419_v13, %v434_v15  ;;  %v443_v20 = vcombine.high %v419_v13, %v434_v15 }
 0x2f5   :  { %v450_v21 = vrot.slane %v442_v19, %v449_v56  ;;  %v458_v22 = vcombine.low %v426_v17, %v441_v18  ;;  %v459_v23 = vcombine.high %v426_v17, %v441_v18  ;;  %v457_v24 = vrot.slane %v443_v20, %v449_v56 }
 0x2f7   :  { %483 = vrot.lane.b32.xlu1 %v457_v24, %s845_s14  ;;  %v473_v25 = vrot.slane %v459_v23, %v449_v56  ;;  %v474_v26 = vcombine.high %v450_v21, %v836_v0  ;;  %v466_v27 = vrot.slane %v458_v22, %v449_v56  ;;  %v475_v28 = vcombine.high %v457_v24, %v836_v0 }
 0x2f9   :  { %495 = vrot.lane.b32.xlu0 %v473_v25, %s845_s14  ;;  %v476_v30 = vcombine.high %v466_v27, %v836_v0  ;;  %v477_v32 = vcombine.high %v473_v25, %v836_v0 }
 0x2fb   :  { %479 = vrot.lane.b32.xlu1 %v474_v26, %s842_s11 }
 0x2fd   :  { %487 = vrot.lane.b32.xlu0 %v475_v28, %s846_s15 }
 0x2ff   :  { %491 = vrot.lane.b32.xlu1 %v476_v30, %s842_s11 }
 0x301   :  { %613 = vrot.lane.b32.xlu0 %v587_v31, %s847_s16 }
 0x303   :  { %499 = vrot.lane.b32.xlu1 %v477_v32, %s846_s15 }
 0x307   :  { %609 = vrot.lane.b32.xlu1 %v583_v29, %s848_s17 }
 0x369   :  { %v484_v38 = vpop.permute.xlu1 %483 }
 0x36b   :  { %v496_v39 = vpop.permute.xlu0 %495 }
 0x36d   :  { %v480_v40 = vpop.permute.xlu1 %479 }
 0x36e   :  { %v502_v41 = vsel %vm72_vm1, %v450_v21, %v480_v40 }
 0x36f   :  { %v504_v44 = vsel %vm503_vm7, %v502_v41, %v484_v38  ;;  %v488_v45 = vpop.permute.xlu0 %487 }
 0x370   :  { %v506_v50 = vsel %vm505_vm10, %v504_v44, %v488_v45 }
 0x371   :  { %v492_v43 = vpop.permute.xlu1 %491 }
 0x372   :  { %v507_v0 = vsel %vm72_vm1, %v466_v27, %v492_v43 }
 0x373   :  { %v508_v48 = vsel %vm503_vm7, %v507_v0, %v496_v39  ;;  %v614_v56 = vpop.permute.xlu0 %613 }
 0x375   :  { %v500_v49 = vpop.permute.xlu1 %499 }
 0x376   :  { %v509_v51 = vsel %vm505_vm10, %v508_v48, %v500_v49 }
 0x377   :  { %v512_v52 = vcombine.low %v506_v50, %v509_v51 }
 0x379   :  { %666 = vst.sshfl [vmem:[#allocation8] sm:$0x33 pattern:$0x76325410] %v512_v52  ;;  %v610_v55 = vpop.permute.xlu1 %609 }
 0x37a   :  { %v625_v57 = vsel %vm624_vm12, %v623_v54, %v610_v55 }
 0x37b   :  { %794 = shalt.err (!%p791_p5)
}
 0x37c   :  { %639 = dma.vmem_to_hbm [thread:$0]  %s637_s19, 64, %s956_s4, [#allocation4]   ;;  %v627_v58 = vsel %vm626_vm13, %v625_v57, %v614_v56 }
 0x37d   :  { %629 = vst.msk [vmem:[#allocation9] sm:$0x3] %vm628_vm14, %v627_v58  ;;  %s803_s25 = scalar_lea.vmem %s647_s21, 32  ;;  %p808_p7 = scmp.lt.s32.totalorder %s647_s21, %s647_s21 }
 0x37e   :  { %p804_p6 = scmp.ne.s32.totalorder %s647_s21, %s803_s25  ;;  %p809_p8 = scmp.lt.s32.totalorder %s803_s25, %s803_s25 }
 0x380   :  { %p810_p9 = por %p809_p8, %p808_p7 }
 0x382   :  { %p811_p10 = pnand %p810_p9, %p804_p6 }
 0x384   :  { %814 = shalt.err (!%p811_p10)
}
 0x385   :  { %649 = dma.vmem_to_hbm [thread:$0]  %s647_s21, 32, %s957_s5, [#allocation10]  }
 0x386   :  { %827 = dma.done.wait [#allocation4], 64  }
 0x387   :  { %828 = vsyncadd [#allocation4], 4294967232 }
 0x388   :  { %829 = dma.done.wait [#allocation10], 32  }
 0x389   :  { %830 = vsyncadd [#allocation10], 4294967264 }
 0x38a   :  { %656 = vsyncpa [#allocation3], 1 }
 0x38b   :  { %657 = vsyncpa [#allocation6], 1 }
 0x38c   :  { %658 = vsyncpa [#allocation4], 1 }
 0x38d   :  { %659 = vsyncpa [#allocation10], 1 }

</bundles_post_ra>
